<compile_context>
chip_gen: v7x
topology: tpu7x:2x2x1
jax: 0.10.0
libtpu: 0.0.40
codegen_flags: <defaults>
</compile_context>

<pallas_src>
import functools

import jax
import jax.numpy as jnp
import numpy as np
from jax.experimental import pallas as pl
from jax.experimental.pallas import tpu as pltpu


# ---------------------------------------------------------------------------
# Pallas kernel
# ---------------------------------------------------------------------------

def cheb_graph_conv_kernel(x_ref, gso_ref, w_ref, b_ref, o_ref, *, Ks):
    """Chebyshev graph conv for one batch sample, fully vertex-major.

    x_ref:   (1, N, T*c_in)        input, lanes ordered (t, c_in)
    gso_ref: (N, N)                graph shift operator
    w_ref:   (Ks*T*c_in, T*c_out)  block-diagonal weight: rows (k, t, c_in), cols (t, c_out)
    b_ref:   (1, T*c_out)          bias tiled over t
    o_ref:   (1, N, T*c_out)       output, lanes ordered (t, c_out) -> lane-dense stores
    """
    x0 = x_ref[0]                                    # (N, T*c_in)
    G = gso_ref[...]

    # Chebyshev recursion: z_k[n, (t,c)] = (T_k(G) x)[t, n, c].
    # Each hop is one lane-dense (N, N) @ (N, T*c_in) MXU matmul.
    zs = [x0]
    if Ks >= 2:
        zs.append(jnp.dot(G, x0, preferred_element_type=jnp.float32))
    for k in range(2, Ks):
        zs.append(2.0 * jnp.dot(G, zs[k - 1], preferred_element_type=jnp.float32)
                  - zs[k - 2])

    # Whole-array lane concat of the Ks taps (no sub-vreg slicing), then a single
    # matmul against the block-diagonal weight applies all (k, t) taps at once and
    # yields the output directly in the lane-dense (N, T*c_out) layout.
    z_cat = zs[0] if Ks == 1 else jnp.concatenate(zs, axis=-1)   # (N, Ks*T*c_in)
    out = jnp.dot(z_cat, w_ref[...], preferred_element_type=jnp.float32) + b_ref[...]
    o_ref[0] = out                                   # (N, T*c_out)


# ---------------------------------------------------------------------------
# pallas_call wrapper (layout plumbing stays in JAX glue)
# ---------------------------------------------------------------------------

def cheb_graph_conv(x, gso, weight, bias, *, Ks):
    """x: (B, c_in, T, N) -> (B, T, N, c_out), matching ChebGraphConv.forward."""
    if Ks < 1:
        raise ValueError(f"ERROR: Ks has to be a positive integer, but received {Ks}.")
    B, c_in, T, N = x.shape
    c_out = weight.shape[-1]

    # Vertex-major per-sample view: [b, n, (t, c_in)].
    xv = jnp.transpose(x, (0, 3, 2, 1)).reshape(B, N, T * c_in)

    # Block-diagonal weight: Wblk[(k, t, i), (u, j)] = eye[t, u] * W[k, i, j].
    # Built once per call in XLA; constant index_map -> fetched into VMEM once.
    eye_t = jnp.eye(T, dtype=weight.dtype)
    w_blk = jnp.einsum("kij,tu->ktiuj", weight, eye_t).reshape(Ks * T * c_in, T * c_out)

    if bias is None:
        b_row = jnp.zeros((1, T * c_out), jnp.float32)
    else:
        b_row = jnp.tile(bias.reshape(1, c_out), (1, T))          # (1, T*c_out)

    kern = functools.partial(cheb_graph_conv_kernel, Ks=Ks)
    out_vm = pl.pallas_call(
        kern,
        out_shape=jax.ShapeDtypeStruct((B, N, T * c_out), jnp.float32),
        grid=(B,),
        in_specs=[
            pl.BlockSpec((1, N, T * c_in), lambda b: (b, 0, 0)),
            pl.BlockSpec((N, N), lambda b: (0, 0)),
            pl.BlockSpec((Ks * T * c_in, T * c_out), lambda b: (0, 0)),
            pl.BlockSpec((1, T * c_out), lambda b: (0, 0)),
        ],
        out_specs=pl.BlockSpec((1, N, T * c_out), lambda b: (b, 0, 0)),
        compiler_params=pltpu.CompilerParams(dimension_semantics=("parallel",)),
    )(xv, gso, w_blk, b_row)

    # (B, N, T*c_out) -> (B, T, N, c_out): wrapper-side layout plumbing on a tiny slab.
    return jnp.transpose(out_vm.reshape(B, N, T, c_out), (0, 2, 1, 3))


# ---------------------------------------------------------------------------
# Pure-JAX reference mirroring the PyTorch forward (for validation)
# ---------------------------------------------------------------------------

def reference_cheb_graph_conv(x, gso, weight, bias, Ks):
    P = jax.lax.Precision.HIGHEST
    xp = jnp.transpose(x, (0, 2, 3, 1))                              # (B,T,N,c_in)
    x_list = [xp]
    if Ks >= 2:
        x_list.append(jnp.einsum("hi,btij->bthj", gso, xp, precision=P))
    for k in range(2, Ks):
        x_list.append(jnp.einsum("hi,btij->bthj", 2.0 * gso, x_list[k - 1], precision=P)
                      - x_list[k - 2])
    xs = jnp.stack(x_list, axis=2)                                   # (B,T,Ks,N,c_in)
    out = jnp.einsum("btkhi,kij->bthj", xs, weight, precision=P)
    if bias is not None:
        out = out + bias
    return out


# ---------------------------------------------------------------------------
# main
# ---------------------------------------------------------------------------

if __name__ == "__main__":
    Ks = 3
    B, c_in, T, N = 2, 16, 8, 16
    c_out = 32

    key = jax.random.PRNGKey(0)
    k1, k2, k3, k4 = jax.random.split(key, 4)
    x = jax.random.normal(k1, (B, c_in, T, N), jnp.float32)
    gso = jax.random.normal(k2, (N, N), jnp.float32) / N
    gso = 0.5 * (gso + gso.T)                                        # symmetric GSO
    weight = jax.random.normal(k3, (Ks, c_in, c_out), jnp.float32) * 0.1
    bias = jax.random.normal(k4, (c_out,), jnp.float32) * 0.1

    fwd = jax.jit(functools.partial(cheb_graph_conv, Ks=Ks))
    out = fwd(x, gso, weight, bias)
    out = jax.block_until_ready(out)

    ref = reference_cheb_graph_conv(x, gso, weight, bias, Ks)
    np.testing.assert_allclose(np.asarray(out), np.asarray(ref), rtol=2e-2, atol=2e-2)
    print("KERNEL_OK")
</pallas_src>

<mosaic_0001>
module attributes {stable_mosaic.version = 11 : i64} {
  func.func @cheb_graph_conv_kernel(%arg0: i32, %arg1: memref<1x16x128xf32, #tpu.memory_space<vmem>>, %arg2: memref<16x16xf32, #tpu.memory_space<vmem>>, %arg3: memref<384x256xf32, #tpu.memory_space<vmem>>, %arg4: memref<1x256xf32, #tpu.memory_space<vmem>>, %arg5: memref<1x16x256xf32, #tpu.memory_space<vmem>>) attributes {dimension_semantics = [#tpu.dimension_semantics<parallel>], iteration_bounds = array<i64: 2>, scalar_prefetch = 0 : i64, scratch_operands = 0 : i64, tpu.core_type = #tpu.core_type<tc>, window_params = [{transform_indices = @transform_0, window_bounds = array<i64: 1, 16, 128>}, {pipeline_mode = #tpu.pipeline_mode<synchronous>, transform_indices = @transform_1, window_bounds = array<i64: 16, 16>}, {pipeline_mode = #tpu.pipeline_mode<synchronous>, transform_indices = @transform_2, window_bounds = array<i64: 384, 256>}, {pipeline_mode = #tpu.pipeline_mode<synchronous>, transform_indices = @transform_3, window_bounds = array<i64: 1, 256>}, {transform_indices = @transform_4, window_bounds = array<i64: 1, 16, 256>}]} {
    %c0 = arith.constant 0 : index
    %c0_0 = arith.constant 0 : index
    %c0_1 = arith.constant 0 : index
    %0 = vector.load %arg1[%c0, %c0_0, %c0_1] : memref<1x16x128xf32, #tpu.memory_space<vmem>>, vector<1x16x128xf32>
    %1 = vector.shape_cast %0 : vector<1x16x128xf32> to vector<16x128xf32>
    %c0_2 = arith.constant 0 : index
    %c0_3 = arith.constant 0 : index
    %2 = vector.load %arg2[%c0_2, %c0_3] : memref<16x16xf32, #tpu.memory_space<vmem>>, vector<16x16xf32>
    %cst = arith.constant dense<0.000000e+00> : vector<16x128xf32>
    %3 = tpu.matmul %2, %1, %cst {dimension_numbers = #tpu.dot_dimension_numbers<[1], [0], [0], [1], [0, 0, 1, 1], [], []>} : vector<16x16xf32>, vector<16x128xf32>, vector<16x128xf32> -> vector<16x128xf32>
    %cst_4 = arith.constant dense<0.000000e+00> : vector<16x128xf32>
    %4 = tpu.matmul %2, %3, %cst_4 {dimension_numbers = #tpu.dot_dimension_numbers<[1], [0], [0], [1], [0, 0, 1, 1], [], []>} : vector<16x16xf32>, vector<16x128xf32>, vector<16x128xf32> -> vector<16x128xf32>
    %cst_5 = arith.constant 2.000000e+00 : f32
    %5 = vector.broadcast %cst_5 : f32 to vector<16x128xf32>
    %6 = arith.mulf %5, %4 : vector<16x128xf32>
    %7 = arith.subf %6, %1 : vector<16x128xf32>
    %8 = tpu.concatenate %1, %3, %7 in 1 : vector<16x128xf32>, vector<16x128xf32>, vector<16x128xf32> -> vector<16x384xf32>
    %c0_6 = arith.constant 0 : index
    %c0_7 = arith.constant 0 : index
    %9 = vector.load %arg3[%c0_6, %c0_7] : memref<384x256xf32, #tpu.memory_space<vmem>>, vector<384x256xf32>
    %cst_8 = arith.constant dense<0.000000e+00> : vector<16x256xf32>
    %10 = tpu.matmul %8, %9, %cst_8 {dimension_numbers = #tpu.dot_dimension_numbers<[1], [0], [0], [1], [0, 0, 1, 1], [], []>} : vector<16x384xf32>, vector<384x256xf32>, vector<16x256xf32> -> vector<16x256xf32>
    %c0_9 = arith.constant 0 : index
    %c0_10 = arith.constant 0 : index
    %11 = vector.load %arg4[%c0_9, %c0_10] : memref<1x256xf32, #tpu.memory_space<vmem>>, vector<1x256xf32>
    %12 = vector.broadcast %11 : vector<1x256xf32> to vector<16x256xf32>
    %13 = arith.addf %10, %12 : vector<16x256xf32>
    %c0_11 = arith.constant 0 : index
    %c0_12 = arith.constant 0 : index
    %c0_13 = arith.constant 0 : index
    %14 = vector.load %arg5[%c0_11, %c0_12, %c0_13] : memref<1x16x256xf32, #tpu.memory_space<vmem>>, vector<1x16x256xf32>
    %15 = vector.shape_cast %14 : vector<1x16x256xf32> to vector<16x256xf32>
    %16 = vector.shape_cast %13 : vector<16x256xf32> to vector<1x16x256xf32>
    tpu.vector_store %arg5[%c0_11, %c0_12, %c0_13], %16 {strides = array<i32>} : memref<1x16x256xf32, #tpu.memory_space<vmem>>, vector<1x16x256xf32>,
    return
  }
  func.func @transform_0(%arg0: i32) -> (i32, i32, i32) {
    %c0_i32 = arith.constant 0 : i32
    %c0_i32_0 = arith.constant 0 : i32
    %c0_i32_1 = arith.constant 0 : i32
    return %arg0, %c0_i32, %c0_i32_0 : i32, i32, i32
  }
  func.func @transform_1(%arg0: i32) -> (i32, i32) {
    %c0_i32 = arith.constant 0 : i32
    %c0_i32_0 = arith.constant 0 : i32
    %c0_i32_1 = arith.constant 0 : i32
    return %c0_i32, %c0_i32_0 : i32, i32
  }
  func.func @transform_2(%arg0: i32) -> (i32, i32) {
    %c0_i32 = arith.constant 0 : i32
    %c0_i32_0 = arith.constant 0 : i32
    %c0_i32_1 = arith.constant 0 : i32
    return %c0_i32, %c0_i32_0 : i32, i32
  }
  func.func @transform_3(%arg0: i32) -> (i32, i32) {
    %c0_i32 = arith.constant 0 : i32
    %c0_i32_0 = arith.constant 0 : i32
    %c0_i32_1 = arith.constant 0 : i32
    return %c0_i32, %c0_i32_0 : i32, i32
  }
  func.func @transform_4(%arg0: i32) -> (i32, i32, i32) {
    %c0_i32 = arith.constant 0 : i32
    %c0_i32_0 = arith.constant 0 : i32
    %c0_i32_1 = arith.constant 0 : i32
    return %arg0, %c0_i32, %c0_i32_0 : i32, i32, i32
  }
}

</mosaic_0001>

<bundles_post_ra>
// kernel: cheb_graph_conv.1
= control target key start
LH: loop header
LB: loop body
LE: loop exit
PB: predicated region body
PF: predicated region fallthrough
CT: control target
= control target key end

     0   :  { %s878_s15 = smov 0   ;;  %s1214_s0 = inlined_call_operand.vmem [shape: f32[2,16,128], index: 0, kind: input, shape index: {}]   ;;  %s1215_s1 = inlined_call_operand.vmem [shape: f32[16,16], index: 1, kind: input, shape index: {}]   ;;  %s1216_s2 = inlined_call_operand.vmem [shape: f32[384,256], index: 2, kind: input, shape index: {}]   ;;  %s1217_s3 = inlined_call_operand.vmem [shape: f32[1,256], index: 3, kind: input, shape index: {}]   ;;  %s1218_s4 = inlined_call_operand.vmem [shape: f32[2,16,256], index: 4, kind: output, shape index: {}]  }
   0x1 LB: > { %s684_s16 = sadd.s32 4294967295, %s850_s15   ;;  %p688_p0 = scmp.ge.s32.totalorder %s850_s15, 1  ;;  %s850_s15 = sphi %s878_s15, %s14_s15  }
   0x2   : > { %p162_p1 = scmp.lt.s32.totalorder %s850_s15, 3 }
   0x4   : > { %p163_p2 = pnand %p688_p0, %p162_p1 }
   0x5   : > { %p188_p3 = scmp.lt.s32.totalorder (!%p163_p2), %s684_s16, 1  ;;  %v200_v0 = vld [vmem:[%s1215_s1] sm:$0xff] (!%p163_p2)  ;;  %vm202_vm0 = vcmask (!%p163_p2), 130048   ;;  %v364_v1 = vld [vmem:[%s1216_s2 + $0x8] sm:$0xff] (!%p163_p2)  ;;  %v366_v2 = vld [vmem:[%s1216_s2 + $0x18] sm:$0xff] (!%p163_p2) }
   0x6   : > { %166 = sbr.rel (%p163_p2) target bundleno = 679 (0x2a7), region = 36  ;;  %713 = vmatprep.mubr.msk.f32.mxu0 (!%p163_p2), %vm202_vm0, %v200_v0  ;;  %v363_v3 = vld [vmem:[%s1216_s2] sm:$0xff] (!%p163_p2)  ;;  %v365_v4 = vld [vmem:[%s1216_s2 + $0x10] sm:$0xff] (!%p163_p2)  ;;  %v731_v5 = vpack.c.bf16 (!%p163_p2), %v366_v2, %v364_v1  ;;  %v368_v7 = vld [vmem:[%s1216_s2 + $0x28] sm:$0xff] (!%p163_p2) }
   0x7   : > { %v733_v6 = vpack.c.bf16 (!%p163_p2), %v365_v4, %v363_v3  ;;  %v370_v8 = vld [vmem:[%s1216_s2 + $0x38] sm:$0xff] (!%p163_p2)  ;;  %v367_v9 = vld [vmem:[%s1216_s2 + $0x20] sm:$0xff] (!%p163_p2)  ;;  %v369_v11 = vld [vmem:[%s1216_s2 + $0x30] sm:$0xff] (!%p163_p2) }
   0x8   : > { %v735_v10 = vpack.c.bf16 (!%p163_p2), %v370_v8, %v368_v7  ;;  %v372_v12 = vld [vmem:[%s1216_s2 + $0x48] sm:$0xff] (!%p163_p2)  ;;  %v374_v13 = vld [vmem:[%s1216_s2 + $0x58] sm:$0xff] (!%p163_p2)  ;;  %732 = vmatprep.subr.bf16.mxu1 (!%p163_p2), %v731_v5  ;;  %v737_v14 = vpack.c.bf16 (!%p163_p2), %v369_v11, %v367_v9  ;;  %v371_v15 = vld [vmem:[%s1216_s2 + $0x40] sm:$0xff] (!%p163_p2) }
   0x9   : > { %734 = vmatpush1.bf16.msra.mxu1 (!%p163_p2), %v733_v6  ;;  %v739_v18 = vpack.c.bf16 (!%p163_p2), %v374_v13, %v372_v12  ;;  %v373_v19 = vld [vmem:[%s1216_s2 + $0x50] sm:$0xff] (!%p163_p2)  ;;  %v376_v21 = vld [vmem:[%s1216_s2 + $0x68] sm:$0xff] (!%p163_p2)  ;;  %v378_v22 = vld [vmem:[%s1216_s2 + $0x78] sm:$0xff] (!%p163_p2) }
   0xa   : > { %736 = vmatprep.subr.bf16.mxu1 (!%p163_p2), %v735_v10  ;;  %v741_v23 = vpack.c.bf16 (!%p163_p2), %v373_v19, %v371_v15  ;;  %v947_v24 = vld [vmem:[%s1215_s1 + $0x8] sm:$0xff] (!%p163_p2)  ;;  %v743_v25 = vpack.c.bf16 (!%p163_p2), %v378_v22, %v376_v21  ;;  %v375_v26 = vld [vmem:[%s1216_s2 + $0x60] sm:$0xff] (!%p163_p2)  ;;  %v377_v27 = vld [vmem:[%s1216_s2 + $0x70] sm:$0xff] (!%p163_p2) }
   0xb   : > { %v380_v28 = vld [vmem:[%s1216_s2 + $0x88] sm:$0xff] (!%p163_p2)  ;;  %v382_v29 = vld [vmem:[%s1216_s2 + $0x98] sm:$0xff] (!%p163_p2)  ;;  %v745_v30 = vpack.c.bf16 (!%p163_p2), %v377_v27, %v375_v26  ;;  %v379_v32 = vld [vmem:[%s1216_s2 + $0x80] sm:$0xff] (!%p163_p2) }
   0xc   : > { %v747_v31 = vpack.c.bf16 (!%p163_p2), %v382_v29, %v380_v28  ;;  %v381_v33 = vld [vmem:[%s1216_s2 + $0x90] sm:$0xff] (!%p163_p2)  ;;  %v384_v34 = vld [vmem:[%s1216_s2 + $0xa8] sm:$0xff] (!%p163_p2)  ;;  %v386_v35 = vld [vmem:[%s1216_s2 + $0xb8] sm:$0xff] (!%p163_p2) }
   0xd   : > { %s1220_s16 = smov (!%p188_p3, %s684_s16), 1  ;;  %738 = vmatpush1.bf16.msra.mxu1 %v737_v14  ;;  %v749_v36 = vpack.c.bf16 %v381_v33, %v379_v32  ;;  %v751_v37 = vpack.c.bf16 %v386_v35, %v384_v34  ;;  %v383_v38 = vld [vmem:[%s1216_s2 + $0xa0] sm:$0xff]  ;;  %v385_v39 = vld [vmem:[%s1216_s2 + $0xb0] sm:$0xff]  ;;  %v388_v40 = vld [vmem:[%s1216_s2 + $0xc8] sm:$0xff] }
   0xe   : > { %s699_s13 = sshll.u32 %s1220_s16, 4  ;;  %740 = vmatprep.subr.bf16.mxu1 %v739_v18  ;;  %v390_v41 = vld [vmem:[%s1216_s2 + $0xd8] sm:$0xff]  ;;  %v753_v42 = vpack.c.bf16 %v385_v39, %v383_v38  ;;  %v387_v44 = vld [vmem:[%s1216_s2 + $0xc0] sm:$0xff]  ;;  %v389_v45 = vld [vmem:[%s1216_s2 + $0xd0] sm:$0xff]  ;;  %s700_s27 = sshll.u32 %s1220_s16, 5 }
   0xf   : > { %s192_s18 = scalar_lea.vmem %s1214_s0, %s699_s13  ;;  %v755_v43 = vpack.c.bf16 %v390_v41, %v388_v40  ;;  %v392_v46 = vld [vmem:[%s1216_s2 + $0xe8] sm:$0xff]  ;;  %v394_v47 = vld [vmem:[%s1216_s2 + $0xf8] sm:$0xff]  ;;  %v757_v48 = vpack.c.bf16 %v389_v45, %v387_v44  ;;  %v391_v50 = vld [vmem:[%s1216_s2 + $0xe0] sm:$0xff]  ;;  %s197_s30 = scalar_lea.vmem %s1218_s4, %s700_s27 }
  0x10   : > { %v929_v16 = vld [vmem:[%s192_s18] sm:$0xff]  ;;  %v931_v17 = vld [vmem:[%s192_s18 + $0x8] sm:$0xff]  ;;  %v759_v49 = vpack.c.bf16 %v394_v47, %v392_v46  ;;  %v393_v51 = vld [vmem:[%s1216_s2 + $0xf0] sm:$0xff] }
  0x11   : > { %v723_v20 = vpack.c.bf16 %v931_v17, %v929_v16  ;;  %742 = vmatpush1.bf16.msra.mxu1 %v741_v23  ;;  %v396_v52 = vld [vmem:[%s1216_s2 + $0x108] sm:$0xff]  ;;  %v398_v53 = vld [vmem:[%s1216_s2 + $0x118] sm:$0xff]  ;;  %v761_v54 = vpack.c.bf16 %v393_v51, %v391_v50  ;;  %v395_v56 = vld [vmem:[%s1216_s2 + $0x100] sm:$0xff] }
  0x12   : > { %744 = vmatprep.subr.bf16.mxu1 %v743_v25  ;;  %v763_v55 = vpack.c.bf16 %v398_v53, %v396_v52  ;;  %v397_v57 = vld [vmem:[%s1216_s2 + $0x110] sm:$0xff]  ;;  %v400_v58 = vld [vmem:[%s1216_s2 + $0x128] sm:$0xff]  ;;  %v402_v59 = vld [vmem:[%s1216_s2 + $0x138] sm:$0xff] }
  0x13   : > { %724 = vmatprep.subr.bf16.mxu0 %v723_v20  ;;  %v765_v60 = vpack.c.bf16 %v397_v57, %v395_v56  ;;  %v767_v61 = vpack.c.bf16 %v402_v59, %v400_v58  ;;  %v399_v62 = vld [vmem:[%s1216_s2 + $0x120] sm:$0xff]  ;;  %v401_v63 = vld [vmem:[%s1216_s2 + $0x130] sm:$0xff]  ;;  %v406_v1 = vld [vmem:[%s1216_s2 + $0x158] sm:$0xff] }
  0x14   : > { %726 = vmatpush3.bf16.msra.mxu0 %v723_v20  ;;  %v769_v2 = vpack.c.bf16 %v401_v63, %v399_v62  ;;  %v403_v4 = vld [vmem:[%s1216_s2 + $0x140] sm:$0xff]  ;;  %v405_v5 = vld [vmem:[%s1216_s2 + $0x150] sm:$0xff]  ;;  %v408_v6 = vld [vmem:[%s1216_s2 + $0x168] sm:$0xff] }
  0x15   : > { %746 = vmatpush1.bf16.msra.mxu1 %v745_v30  ;;  %v410_v7 = vld [vmem:[%s1216_s2 + $0x178] sm:$0xff]  ;;  %v773_v8 = vpack.c.bf16 %v405_v5, %v403_v4  ;;  %v407_v10 = vld [vmem:[%s1216_s2 + $0x160] sm:$0xff]  ;;  %v409_v11 = vld [vmem:[%s1216_s2 + $0x170] sm:$0xff] }
  0x16   : > { %748 = vmatprep.subr.bf16.mxu1 %v747_v31  ;;  %v775_v9 = vpack.c.bf16 %v410_v7, %v408_v6  ;;  %v412_v12 = vld [vmem:[%s1216_s2 + $0x188] sm:$0xff]  ;;  %v414_v13 = vld [vmem:[%s1216_s2 + $0x198] sm:$0xff]  ;;  %v777_v14 = vpack.c.bf16 %v409_v11, %v407_v10  ;;  %v411_v18 = vld [vmem:[%s1216_s2 + $0x180] sm:$0xff] }
  0x17   : > { %714 = vmatmul.mubr.msk.f32.vlgmr.msra.gmra.mrb[0].mxu0 %vm202_vm0, %v947_v24  ;;  %v779_v15 = vpack.c.bf16 %v414_v13, %v412_v12  ;;  %v413_v19 = vld [vmem:[%s1216_s2 + $0x190] sm:$0xff]  ;;  %v416_v20 = vld [vmem:[%s1216_s2 + $0x1a8] sm:$0xff]  ;;  %v418_v21 = vld [vmem:[%s1216_s2 + $0x1b8] sm:$0xff] }
  0x18   : > { %720 = vmatprep.mubr.msk.f32.mxu0 %vm202_vm0, %v200_v0  ;;  %v404_v0 = vld [vmem:[%s1216_s2 + $0x148] sm:$0xff]  ;;  %v781_v22 = vpack.c.bf16 %v413_v19, %v411_v18  ;;  %v783_v23 = vpack.c.bf16 %v418_v21, %v416_v20  ;;  %v415_v25 = vld [vmem:[%s1216_s2 + $0x1a0] sm:$0xff]  ;;  %v417_v26 = vld [vmem:[%s1216_s2 + $0x1b0] sm:$0xff] }
  0x19   : > { %750 = vmatpush1.bf16.msra.mxu1 %v749_v36  ;;  %v771_v3 = vpack.c.bf16 %v406_v1, %v404_v0  ;;  %v420_v27 = vld [vmem:[%s1216_s2 + $0x1c8] sm:$0xff]  ;;  %v422_v28 = vld [vmem:[%s1216_s2 + $0x1d8] sm:$0xff]  ;;  %v785_v29 = vpack.c.bf16 %v417_v26, %v415_v25  ;;  %v419_v31 = vld [vmem:[%s1216_s2 + $0x1c0] sm:$0xff] }
  0x1a   : > { %752 = vmatprep.subr.bf16.mxu1 %v751_v37  ;;  %v787_v30 = vpack.c.bf16 %v422_v28, %v420_v27  ;;  %v421_v32 = vld [vmem:[%s1216_s2 + $0x1d0] sm:$0xff]  ;;  %v424_v33 = vld [vmem:[%s1216_s2 + $0x1e8] sm:$0xff]  ;;  %v426_v34 = vld [vmem:[%s1216_s2 + $0x1f8] sm:$0xff] }
  0x1b   : > { %v789_v35 = vpack.c.bf16 %v421_v32, %v419_v31  ;;  %v791_v36 = vpack.c.bf16 %v426_v34, %v424_v33  ;;  %v423_v37 = vld [vmem:[%s1216_s2 + $0x1e0] sm:$0xff]  ;;  %v425_v38 = vld [vmem:[%s1216_s2 + $0x1f0] sm:$0xff]  ;;  %v428_v40 = vld [vmem:[%s1216_s2 + $0x208] sm:$0xff] }
  0x1c   : > { %v793_v39 = vpack.c.bf16 %v425_v38, %v423_v37  ;;  %v430_v41 = vld [vmem:[%s1216_s2 + $0x218] sm:$0xff]  ;;  %v427_v46 = vld [vmem:[%s1216_s2 + $0x200] sm:$0xff]  ;;  %v429_v47 = vld [vmem:[%s1216_s2 + $0x210] sm:$0xff] }
  0x1d   : > { %754 = vmatpush1.bf16.msra.mxu1 %v753_v42  ;;  %v795_v45 = vpack.c.bf16 %v430_v41, %v428_v40  ;;  %v797_v50 = vpack.c.bf16 %v429_v47, %v427_v46  ;;  %v431_v52 = vld [vmem:[%s1216_s2 + $0x220] sm:$0xff]  ;;  %v433_v53 = vld [vmem:[%s1216_s2 + $0x230] sm:$0xff]  ;;  %v444_v1 = vld [vmem:[%s1216_s2 + $0x288] sm:$0xff]  ;;  %v461_v40 = vlaneseq }
  0x1e   : > { %756 = vmatprep.subr.bf16.mxu1 %v755_v43  ;;  %v801_v56 = vpack.c.bf16 %v433_v53, %v431_v52  ;;  %v435_v58 = vld [vmem:[%s1216_s2 + $0x240] sm:$0xff]  ;;  %v437_v59 = vld [vmem:[%s1216_s2 + $0x250] sm:$0xff]  ;;  %v448_v7 = vld [vmem:[%s1216_s2 + $0x2a8] sm:$0xff] }
  0x1f   : > { %v439_v63 = vld [vmem:[%s1216_s2 + $0x260] sm:$0xff]  ;;  %v441_v0 = vld [vmem:[%s1216_s2 + $0x270] sm:$0xff]  ;;  %v452_v13 = vld [vmem:[%s1216_s2 + $0x2c8] sm:$0xff]  ;;  %v462_v41 = vshrl.u32 %v461_v40, 7 }
  0x20   : > { %v443_v5 = vld [vmem:[%s1216_s2 + $0x280] sm:$0xff]  ;;  %v445_v6 = vld [vmem:[%s1216_s2 + $0x290] sm:$0xff] }
  0x21   : > { %758 = vmatpush1.bf16.msra.mxu1 %v757_v48  ;;  %v432_v48 = vld [vmem:[%s1216_s2 + $0x228] sm:$0xff]  ;;  %v447_v11 = vld [vmem:[%s1216_s2 + $0x2a0] sm:$0xff]  ;;  %v449_v12 = vld [vmem:[%s1216_s2 + $0x2b0] sm:$0xff] }
  0x22   : > { %760 = vmatprep.subr.bf16.mxu1 %v759_v49  ;;  %v434_v49 = vld [vmem:[%s1216_s2 + $0x238] sm:$0xff]  ;;  %v451_v19 = vld [vmem:[%s1216_s2 + $0x2c0] sm:$0xff]  ;;  %v453_v20 = vld [vmem:[%s1216_s2 + $0x2d0] sm:$0xff] }
  0x23   : > { %v799_v51 = vpack.c.bf16 %v434_v49, %v432_v48  ;;  %v821_v21 = vpack.c.bf16 %v453_v20, %v451_v19  ;;  %v455_v26 = vld [vmem:[%s1216_s2 + $0x2e0] sm:$0xff]  ;;  %v457_v27 = vld [vmem:[%s1216_s2 + $0x2f0] sm:$0xff] }
  0x24   : > { %v825_v28 = vpack.c.bf16 %v457_v27, %v455_v26 }
  0x25   : > { %762 = vmatpush1.bf16.msra.mxu1 %v761_v54  ;;  %v436_v54 = vld [vmem:[%s1216_s2 + $0x248] sm:$0xff] }
  0x26   : > { %764 = vmatprep.subr.bf16.mxu1 %v763_v55  ;;  %v438_v55 = vld [vmem:[%s1216_s2 + $0x258] sm:$0xff] }
  0x27   : > { %v803_v57 = vpack.c.bf16 %v438_v55, %v436_v54 }
  0x29   : > { %766 = vmatpush1.bf16.msra.mxu1 %v765_v60  ;;  %v440_v60 = vld [vmem:[%s1216_s2 + $0x268] sm:$0xff] }
  0x2a   : > { %768 = vmatprep.subr.bf16.mxu1 %v767_v61  ;;  %v805_v61 = vpack.c.bf16 %v437_v59, %v435_v58 }
  0x2d   : > { %770 = vmatpush1.bf16.msra.mxu1 %v769_v2  ;;  %v446_v2 = vld [vmem:[%s1216_s2 + $0x298] sm:$0xff] }
  0x2e   : > { %772 = vmatprep.subr.bf16.mxu1 %v771_v3  ;;  %v809_v3 = vpack.c.bf16 %v441_v0, %v439_v63  ;;  %v811_v4 = vpack.c.bf16 %v446_v2, %v444_v1 }
  0x31   : > { %774 = vmatpush1.bf16.msra.mxu1 %v773_v8  ;;  %v450_v8 = vld [vmem:[%s1216_s2 + $0x2b8] sm:$0xff] }
  0x32   : > { %776 = vmatprep.subr.bf16.mxu1 %v775_v9  ;;  %v813_v9 = vpack.c.bf16 %v445_v6, %v443_v5  ;;  %v815_v10 = vpack.c.bf16 %v450_v8, %v448_v7 }
  0x35   : > { %778 = vmatpush1.bf16.msra.mxu1 %v777_v14  ;;  %v454_v14 = vld [vmem:[%s1216_s2 + $0x2d8] sm:$0xff] }
  0x36   : > { %780 = vmatprep.subr.bf16.mxu1 %v779_v15  ;;  %v817_v15 = vpack.c.bf16 %v449_v12, %v447_v11  ;;  %v819_v18 = vpack.c.bf16 %v454_v14, %v452_v13 }
  0x39   : > { %782 = vmatpush1.bf16.msra.mxu1 %v781_v22  ;;  %v456_v22 = vld [vmem:[%s1216_s2 + $0x2e8] sm:$0xff] }
  0x3a   : > { %784 = vmatprep.subr.bf16.mxu1 %v783_v23  ;;  %v458_v23 = vld [vmem:[%s1216_s2 + $0x2f8] sm:$0xff] }
  0x3b   : > { %v823_v25 = vpack.c.bf16 %v458_v23, %v456_v22 }
  0x3d   : > { %786 = vmatpush1.bf16.msra.mxu1 %v785_v29  ;;  %v852_v29 = vmov 0.0  }
  0x3e   : > { %788 = vmatprep.subr.bf16.mxu1 %v787_v30 }
  0x41   : > { %790 = vmatpush1.bf16.msra.mxu1 %v789_v35 }
  0x42   : > { %792 = vmatprep.subr.bf16.mxu1 %v791_v36 }
  0x45   : > { %794 = vmatpush1.bf16.msra.mxu1 %v793_v39 }
  0xea   : > { %v715_v42 = vpop.f32.mrb[0].mxu0 }
  0xeb   : > { %v275_v43 = vpop.f32.mrb[1].mxu0 }
  0xec   : > { %v727_v44 = vpack.c.bf16 %v715_v42, %v275_v43  ;;  %535 = vmatprep.mubr.f32.mxu1 %v275_v43  ;;  %v459_v43 = vld [vmem:[%s1217_s3] sm:$0x3] }
  0xed   : > { %536 = vmatmul.mubr.f32.vlgmr.msra.gmra.mrb[0].mxu1 %v929_v16 }
  0xee   : > { %728 = vmatprep.subr.bf16.mxu0 %v727_v44  ;;  %541 = vmatprep.mubr.f32.mxu1 %v715_v42  ;;  %v463_v42 = vsub.s32 0, %v462_v41 }
  0xef   : > { %730 = vmatpush3.bf16.msra.mxu0 %v727_v44  ;;  %v467_v44 = vsub.s32 1, %v462_v41 }
  0xf0   : > { %796 = vmatprep.subr.bf16.mxu0 %v795_v45  ;;  %v464_v45 = vrot.slane %v459_v43, %v463_v42 }
  0xf1   : > { %542 = vmatmul.mubr.f32.gmra.mrb[2].mxu1 %v931_v17  ;;  %v468_v46 = vrot.slane %v459_v43, %v467_v44 }
  0xf2   : > { %721 = vmatmul.mubr.msk.f32.vlgmr.msra.gmra.mrb[2].mxu0 %vm202_vm0, %v947_v24  ;;  %v442_v24 = vld [vmem:[%s1216_s2 + $0x278] sm:$0xff] }
  0xf3   : > { %798 = vmatpush1.bf16.msra.mxu0 %v797_v50  ;;  %v807_v62 = vpack.c.bf16 %v442_v24, %v440_v60  ;;  %612 = vmatprep.mubr.f32.mxu0 %v852_v29 }
  0xf4   : > { %800 = vmatprep.subr.bf16.mxu0 %v799_v51 }
  0xf7   : > { %802 = vmatpush1.bf16.msra.mxu0 %v801_v56 }
  0xf8   : > { %804 = vmatprep.subr.bf16.mxu0 %v803_v57 }
  0xfb   : > { %806 = vmatpush1.bf16.msra.mxu0 %v805_v61 }
  0xfc   : > { %808 = vmatprep.subr.bf16.mxu0 %v807_v62 }
  0xff   : > { %810 = vmatpush1.bf16.msra.mxu0 %v809_v3 }
 0x100   : > { %812 = vmatprep.subr.bf16.mxu0 %v811_v4 }
 0x103   : > { %814 = vmatpush1.bf16.msra.mxu0 %v813_v9 }
 0x104   : > { %816 = vmatprep.subr.bf16.mxu0 %v815_v10 }
 0x107   : > { %818 = vmatpush1.bf16.msra.mxu0 %v817_v15 }
 0x108   : > { %820 = vmatprep.subr.bf16.mxu0 %v819_v18 }
 0x10b   : > { %822 = vmatpush1.bf16.msra.mxu0 %v821_v21 }
 0x10c   : > { %824 = vmatprep.subr.bf16.mxu0 %v823_v25 }
 0x10f   : > { %826 = vmatpush1.bf16.msra.mxu0 %v825_v28 }
 0x1c0   : > { %v537_v30 = vpop.f32.mrb[0].mxu1 }
 0x1c1   : > { %v539_v31 = vpop.f32.mrb[1].mxu1  ;;  %v538_v47 = vadd.f32 %v537_v30, %v464_v45 }
 0x1c4   : > { %v543_v38 = vpop.f32.mrb[2].mxu1 }
 0x1c5   : > { %v722_v32 = vpop.f32.mrb[2].mxu0  ;;  %v545_v39 = vpop.f32.mrb[3].mxu1  ;;  %v544_v50 = vadd.f32 %v543_v38, %v464_v45 }
 0x1c6   : > { %v350_v33 = vpop.f32.mrb[3].mxu0  ;;  %v360_v35 = vmul.f32 2.0, %v722_v32  ;;  %v546_v52 = vadd.f32 %v545_v39, %v468_v46 }
 0x1c7   : > { %v359_v34 = vmul.f32 2.0, %v350_v33 }
 0x1c8   : > { %v362_v37 = vsub.f32 %v360_v35, %v931_v17 }
 0x1c9   : > { %v361_v36 = vsub.f32 %v359_v34, %v929_v16  ;;  %v540_v16 = vadd.f32 %v539_v31, %v468_v46 }
 0x1cb   : > { %613 = vmatmul.mubr.f32.vlgmr.msra.gmra.mrb[4].mxu0 %v361_v36 }
 0x1cc   : > { %618 = vmatprep.mubr.f32.mxu0 %v852_v29 }
 0x1cf   : > { %619 = vmatmul.mubr.f32.gmra.mrb[6].mxu0 %v362_v37 }
 0x29e   : > { %v614_v17 = vpop.f32.mrb[4].mxu0 }
 0x29f   : > { %v615_v48 = vadd.f32 %v614_v17, %v538_v47  ;;  %v616_v49 = vpop.f32.mrb[5].mxu0 }
 0x2a0   : > { %v617_v51 = vadd.f32 %v616_v49, %v540_v16 }
 0x2a1   : > { %625 = vst [vmem:[%s197_s30] sm:$0xff] %v615_v48 }
 0x2a2   : > { %626 = vst [vmem:[%s197_s30 + $0x8] sm:$0xff] %v617_v51  ;;  %v620_v53 = vpop.f32.mrb[6].mxu0 }
 0x2a3   : > { %v621_v54 = vadd.f32 %v620_v53, %v544_v50  ;;  %v622_v55 = vpop.f32.mrb[7].mxu0 }
 0x2a4   : > { %v623_v56 = vadd.f32 %v622_v55, %v546_v52 }
 0x2a5   : > { %627 = vst [vmem:[%s197_s30 + $0x10] sm:$0xff] %v621_v54 }
 0x2a6   : > { %628 = vst [vmem:[%s197_s30 + $0x18] sm:$0xff] %v623_v56 }
 0x2a7 PF: > { %s14_s15 = sadd.s32 1, %s850_s15  }
 0x2a8   : > { %p11_p4 = scmp.ge.s32.totalorder %s14_s15, 4  }
 0x2aa   :  { %13 = sbr.rel (!%p11_p4) target bundleno = 1 (0x1), region = 66 }

</bundles_post_ra>
